<compile_context>
chip_gen: v5e
topology: v5e:2x2
jax: 0.10.0
libtpu: 0.0.40
codegen_flags: <defaults>
</compile_context>

<pallas_src>
import jax
import jax.numpy as jnp
from jax.experimental import pallas as pl
from jax.experimental.pallas import tpu as pltpu

_LANE_W = 1024        # lane-dense slab width (multiple of 128)
_MAX_TILE_ROWS = 512  # 512 x 1024 f32 = 2 MiB per block


def _round_up(a, b):
    return (a + b - 1) // b * b


def _int_pow(x, p):
    """Exponentiation by squaring, unrolled at trace time (VPU-only)."""
    if p == 0:
        return jnp.ones_like(x)
    neg = p < 0
    p = abs(p)
    result = None
    base = x
    while p:
        if p & 1:
            result = base if result is None else result * base
        p >>= 1
        if p:
            base = base * base
    if neg:
        result = 1.0 / result
    return result


def pow_pallas(x, q):
    """Elementwise x ** q. x: any-shape float array, q: scalar float."""
    x = jnp.asarray(x, jnp.float32)
    orig_shape = x.shape
    n = int(x.size)

    # Static integer-exponent fast path (only when q is concrete at trace time).
    q_static = None
    try:
        qv = float(q)
        if qv == int(qv) and abs(qv) <= 32:
            q_static = int(qv)
    except Exception:
        q_static = None

    # Lane-dense 2-D layout (rows, W), tiled along rows.
    w = _LANE_W
    rows = _round_up(pl.cdiv(max(n, 1), w), 8)      # at least one (8, 128) tile
    tile_rows = min(_MAX_TILE_ROWS, rows)
    rows = _round_up(rows, tile_rows)
    n_pad = rows * w

    flat = x.reshape(-1)
    if n_pad != n:
        # Pad with ones: 1 ** q is finite/exact for any exponent.
        flat = jnp.pad(flat, (0, n_pad - n), constant_values=1.0)
    x2d = flat.reshape(rows, w)

    grid = (rows // tile_rows,)
    x_spec = pl.BlockSpec((tile_rows, w), lambda i: (i, 0))
    o_spec = pl.BlockSpec((tile_rows, w), lambda i: (i, 0))
    out_shape = jax.ShapeDtypeStruct((rows, w), jnp.float32)
    cparams = pltpu.CompilerParams(dimension_semantics=("parallel",))

    if q_static is not None:
        q_int = q_static

        def _int_pow_kernel(x_ref, o_ref):
            o_ref[...] = _int_pow(x_ref[...], q_int)

        cost = pl.CostEstimate(
            flops=n_pad * max(abs(q_int).bit_length(), 1),
            transcendentals=0,
            bytes_accessed=2 * 4 * n_pad,
        )
        out2d = pl.pallas_call(
            _int_pow_kernel,
            out_shape=out_shape,
            grid_spec=pltpu.PrefetchScalarGridSpec(
                num_scalar_prefetch=0,
                grid=grid,
                in_specs=[x_spec],
                out_specs=o_spec,
            ),
            compiler_params=cparams,
            cost_estimate=cost,
        )(x2d)
    else:
        q_arr = jnp.asarray(q, jnp.float32).reshape(1, 1)

        def _dyn_pow_kernel(q_ref, x_ref, o_ref):
            # Dynamic exponent: exp(q * log(x)) path (positive bases).
            o_ref[...] = jnp.power(x_ref[...], q_ref[0, 0])

        cost = pl.CostEstimate(
            flops=2 * n_pad,
            transcendentals=2 * n_pad,
            bytes_accessed=2 * 4 * n_pad,
        )
        out2d = pl.pallas_call(
            _dyn_pow_kernel,
            out_shape=out_shape,
            grid_spec=pltpu.PrefetchScalarGridSpec(
                num_scalar_prefetch=0,
                grid=grid,
                in_specs=[
                    pl.BlockSpec(memory_space=pltpu.SMEM),  # q scalar
                    x_spec,
                ],
                out_specs=o_spec,
            ),
            compiler_params=cparams,
            cost_estimate=cost,
        )(q_arr, x2d)

    if n_pad == n:
        return out2d.reshape(orig_shape)
    return out2d.reshape(-1)[:n].reshape(orig_shape)


if __name__ == "__main__":
    key = jax.random.PRNGKey(0)

    # Tensor input incl. negative bases: exercises the integer-pow fast path,
    # which matches PyTorch semantics (e.g. (-2.0) ** 3 == -8.0).
    x = jax.random.uniform(key, (2, 4, 16, 16), jnp.float32, minval=-2.0, maxval=2.0)
    q = 3.0
    out = jax.block_until_ready(pow_pallas(x, q))
    ref = x ** 3
    assert out.shape == x.shape and out.dtype == jnp.float32
    assert jnp.allclose(out, ref, rtol=1e-5, atol=1e-5), "integer-pow mismatch"

    # Dynamic (non-integer) exponent path, positive bases.
    xp = jax.random.uniform(jax.random.PRNGKey(1), (2, 4, 16, 16), jnp.float32,
                            minval=0.5, maxval=2.0)
    qd = jnp.float32(2.5)
    out_d = jax.block_until_ready(pow_pallas(xp, qd))
    ref_d = jnp.power(xp, qd)
    assert jnp.allclose(out_d, ref_d, rtol=1e-4, atol=1e-5), "dynamic pow mismatch"

    # Scalar case matching the PyTorch snippet exactly: 5.0 ** 3.0 == 125.0.
    out_s = jax.block_until_ready(pow_pallas(jnp.float32(5.0), jnp.float32(3.0)))
    assert jnp.allclose(out_s, 125.0, rtol=1e-6), "scalar pow mismatch"

    print("KERNEL_OK")
</pallas_src>

<mosaic_0001>
module attributes {stable_mosaic.version = 11 : i64} {
  func.func @_int_pow_kernel(%arg0: i32, %arg1: memref<8x1024xf32, #tpu.memory_space<vmem>>, %arg2: memref<8x1024xf32, #tpu.memory_space<vmem>>) attributes {dimension_semantics = [#tpu.dimension_semantics<parallel>], iteration_bounds = array<i64: 1>, scalar_prefetch = 0 : i64, scratch_operands = 0 : i64, tpu.core_type = #tpu.core_type<tc>, window_params = [{transform_indices = @transform_0, window_bounds = array<i64: 8, 1024>}, {transform_indices = @transform_1, window_bounds = array<i64: 8, 1024>}]} {
    %c0 = arith.constant 0 : index
    %c0_0 = arith.constant 0 : index
    %0 = vector.load %arg1[%c0, %c0_0] : memref<8x1024xf32, #tpu.memory_space<vmem>>, vector<8x1024xf32>
    %1 = arith.mulf %0, %0 : vector<8x1024xf32>
    %2 = arith.mulf %0, %1 : vector<8x1024xf32>
    %c0_1 = arith.constant 0 : index
    %c0_2 = arith.constant 0 : index
    %3 = vector.load %arg2[%c0_1, %c0_2] : memref<8x1024xf32, #tpu.memory_space<vmem>>, vector<8x1024xf32>
    tpu.vector_store %arg2[%c0_1, %c0_2], %2 {strides = array<i32>} : memref<8x1024xf32, #tpu.memory_space<vmem>>, vector<8x1024xf32>,
    return
  }
  func.func @transform_0(%arg0: i32) -> (i32, i32) {
    %c0_i32 = arith.constant 0 : i32
    %c0_i32_0 = arith.constant 0 : i32
    return %arg0, %c0_i32 : i32, i32
  }
  func.func @transform_1(%arg0: i32) -> (i32, i32) {
    %c0_i32 = arith.constant 0 : i32
    %c0_i32_0 = arith.constant 0 : i32
    return %arg0, %c0_i32 : i32, i32
  }
}

</mosaic_0001>

<bundles_post_ra>
// kernel: tpu_custom_call.1
= control target key start
LH: loop header
LB: loop body
LE: loop exit
PB: predicated region body
PF: predicated region fallthrough
CT: control target
= control target key end

     0   :  { %6 = vsyncpa [#allocation3], 0  ;;  %s144_s0 = inlined_call_operand.hbm [shape: f32[8,1024], index: 0, kind: input, shape index: {}]   ;;  %s145_s1 = inlined_call_operand.hbm [shape: f32[8,1024], index: 1, kind: output, shape index: {}]  }
   0x1   :  { %7 = vsyncpa [#allocation4], 0  ;;  %s13_s8 = sshll.u32 %s144_s0, 4  ;;  %s126_s9 = smov [#allocation2]   ;;  %s14_s8 = int_to_ptr.hbm [resolvable:$true] %s13_s8 }
   0x2   :  { %s15_s10 = sshll.u32 %s126_s9, 4  ;;  %s16_s10 = int_to_ptr.vmem [resolvable:$true] %s15_s10 }
   0x3   :  { %18 = dma.hbm_to_vmem [thread:$0]  %s14_s8, 1024, %s16_s10, [#allocation3]  }
   0x4   :  { %122 = dma.done.wait [#allocation3], 1024  }
   0x5   :  { %123 = vsyncadd [#allocation3], 4294966272  ;;  %v23_v0 = vld [vmem:[#allocation2] sm:$0xff]  ;;  %v24_v1 = vld [vmem:[#allocation2 + $0x8] sm:$0xff]  ;;  %s127_s0 = smov [#allocation5]   ;;  %s62_s14 = sshll.u32 %s145_s1, 4  ;;  %s63_s14 = int_to_ptr.hbm [resolvable:$true] %s62_s14 }
   0x6   :  { %v25_v2 = vld [vmem:[#allocation2 + $0x10] sm:$0xff]  ;;  %v31_v3 = vmul.f32 %v23_v0, %v23_v0  ;;  %v32_v4 = vmul.f32 %v24_v1, %v24_v1  ;;  %v26_v6 = vld [vmem:[#allocation2 + $0x18] sm:$0xff]  ;;  %v27_v7 = vld [vmem:[#allocation2 + $0x20] sm:$0xff]  ;;  %s60_s11 = sshll.u32 %s127_s0, 4  ;;  %s61_s11 = int_to_ptr.vmem [resolvable:$true] %s60_s11 }
   0x7   :  { %v33_v5 = vmul.f32 %v25_v2, %v25_v2  ;;  %v28_v8 = vld [vmem:[#allocation2 + $0x28] sm:$0xff]  ;;  %v34_v9 = vmul.f32 %v26_v6, %v26_v6  ;;  %v35_v10 = vmul.f32 %v27_v7, %v27_v7  ;;  %v29_v12 = vld [vmem:[#allocation2 + $0x30] sm:$0xff]  ;;  %v30_v13 = vld [vmem:[#allocation2 + $0x38] sm:$0xff] }
   0x8   :  { %v36_v11 = vmul.f32 %v28_v8, %v28_v8  ;;  %v39_v14 = vmul.f32 %v31_v3, %v23_v0  ;;  %v40_v15 = vmul.f32 %v32_v4, %v24_v1  ;;  %v37_v17 = vmul.f32 %v29_v12, %v29_v12 }
   0x9   :  { %v41_v16 = vmul.f32 %v33_v5, %v25_v2  ;;  %v42_v18 = vmul.f32 %v34_v9, %v26_v6  ;;  %v38_v19 = vmul.f32 %v30_v13, %v30_v13  ;;  %v43_v20 = vmul.f32 %v35_v10, %v27_v7 }
   0xa   :  { %47 = vst [vmem:[#allocation5] sm:$0xff] %v39_v14  ;;  %v44_v21 = vmul.f32 %v36_v11, %v28_v8  ;;  %v45_v22 = vmul.f32 %v37_v17, %v29_v12 }
   0xb   :  { %48 = vst [vmem:[#allocation5 + $0x8] sm:$0xff] %v40_v15  ;;  %v46_v23 = vmul.f32 %v38_v19, %v30_v13 }
   0xc   :  { %49 = vst [vmem:[#allocation5 + $0x10] sm:$0xff] %v41_v16 }
   0xd   :  { %50 = vst [vmem:[#allocation5 + $0x18] sm:$0xff] %v42_v18 }
   0xe   :  { %51 = vst [vmem:[#allocation5 + $0x20] sm:$0xff] %v43_v20 }
   0xf   :  { %52 = vst [vmem:[#allocation5 + $0x28] sm:$0xff] %v44_v21 }
  0x10   :  { %53 = vst [vmem:[#allocation5 + $0x30] sm:$0xff] %v45_v22 }
  0x11   :  { %54 = vst [vmem:[#allocation5 + $0x38] sm:$0xff] %v46_v23 }
  0x12   :  { %65 = dma.vmem_to_hbm [thread:$0]  %s61_s11, 1024, %s63_s14, [#allocation4]  }
  0x13   :  { %124 = dma.done.wait [#allocation4], 1024  }
  0x14   :  { %125 = vsyncadd [#allocation4], 4294966272 }
  0x15   :  { %70 = vsyncpa [#allocation3], 1 }
  0x16   :  { %71 = vsyncpa [#allocation4], 1 }

</bundles_post_ra>
